<compile_context>
chip_gen: v7x
topology: tpu7x:2x2x1
jax: 0.10.0
libtpu: 0.0.40
codegen_flags: <defaults>
</compile_context>

<pallas_src>
import functools

import jax
import jax.numpy as jnp
from jax.experimental import pallas as pl
from jax.experimental.pallas import tpu as pltpu


# ------------------------------ small helpers -------------------------------

def _round_up(x, m):
    return (x + m - 1) // m * m


def _vmem_limit_bytes():
    # Generation-aware scoped-VMEM budget: ~3/4 of physical VMEM, capped at
    # 96 MiB (v5e/v6e have 128 MiB, v7x has 64 MiB per TensorCore).
    cap = 64 * 1024 * 1024
    try:
        info = pltpu.get_tpu_info()
        cap = int(getattr(info, "vmem_capacity_bytes", cap) or cap)
    except Exception:
        pass
    return max(32 * 1024 * 1024, min((cap * 3) // 4, 96 * 1024 * 1024))


_VMEM_LIMIT = _vmem_limit_bytes()


def _cparams(dim_sem):
    return pltpu.CompilerParams(dimension_semantics=dim_sem,
                                vmem_limit_bytes=_VMEM_LIMIT)


def _pick_divisor_tile(dim, unit, max_tile):
    """Largest multiple of `unit` <= max_tile that divides round_up(dim, unit)."""
    dp = _round_up(dim, unit)
    t = min(max_tile, dp)
    t = max(unit, (t // unit) * unit)
    while dp % t:
        t -= unit
    return t, dp


# ------------------- fused matmul kernel (conv / fc core) -------------------

def _mm_kernel(*refs, relu, has_res):
    if has_res:
        a_ref, w_ref, s_ref, t_ref, r_ref, o_ref, acc_ref = refs
    else:
        a_ref, w_ref, s_ref, t_ref, o_ref, acc_ref = refs
        r_ref = None
    k = pl.program_id(2)

    @pl.when(k == 0)
    def _init():
        acc_ref[...] = jnp.zeros_like(acc_ref)

    acc_ref[...] += jnp.dot(a_ref[...], w_ref[...],
                            preferred_element_type=jnp.float32)

    @pl.when(k == pl.num_programs(2) - 1)
    def _epilogue():
        y = acc_ref[...] * s_ref[...] + t_ref[...]
        if has_res:
            y = y + r_ref[...]
        if relu:
            y = jnp.maximum(y, 0.0)
        o_ref[...] = y.astype(o_ref.dtype)


def matmul_fused(a, w, scale, shift, residual=None, relu=False,
                 out_dtype=jnp.float32):
    """out = act((a @ w) * scale + shift [+ residual]); bf16 MXU, f32 acc."""
    M, K = a.shape
    K2, N = w.shape
    assert K == K2
    tm = min(256, _round_up(M, 8))
    Mp = _round_up(M, tm)
    tn, Np = _pick_divisor_tile(N, 128, 256)   # lane-dense output tiles
    tk, Kp = _pick_divisor_tile(K, 128, 512)

    a_p = jnp.pad(a.astype(jnp.bfloat16), ((0, Mp - M), (0, Kp - K)))
    w_p = jnp.pad(w.astype(jnp.bfloat16), ((0, Kp - K), (0, Np - N)))
    s_p = jnp.pad(scale.astype(jnp.float32).reshape(1, N), ((0, 0), (0, Np - N)))
    t_p = jnp.pad(shift.astype(jnp.float32).reshape(1, N), ((0, 0), (0, Np - N)))

    has_res = residual is not None
    operands = [a_p, w_p, s_p, t_p]
    in_specs = [
        pl.BlockSpec((tm, tk), lambda i, j, k: (i, k)),
        pl.BlockSpec((tk, tn), lambda i, j, k: (k, j)),
        pl.BlockSpec((1, tn), lambda i, j, k: (0, j)),
        pl.BlockSpec((1, tn), lambda i, j, k: (0, j)),
    ]
    if has_res:
        r_p = jnp.pad(residual.astype(jnp.float32), ((0, Mp - M), (0, Np - N)))
        operands.append(r_p)
        in_specs.append(pl.BlockSpec((tm, tn), lambda i, j, k: (i, j)))

    out = pl.pallas_call(
        functools.partial(_mm_kernel, relu=relu, has_res=has_res),
        grid=(Mp // tm, Np // tn, Kp // tk),
        in_specs=in_specs,
        out_specs=pl.BlockSpec((tm, tn), lambda i, j, k: (i, j)),
        out_shape=jax.ShapeDtypeStruct((Mp, Np), out_dtype),
        scratch_shapes=[pltpu.VMEM((tm, tn), jnp.float32)],
        compiler_params=_cparams(("parallel", "parallel", "arbitrary")),
    )(*operands)
    return out[:M, :N]


# ------------------------- gridded BN(+ReLU) kernel --------------------------

def _bn_act_kernel(x_ref, s_ref, t_ref, o_ref, *, relu):
    y = x_ref[...] * s_ref[...] + t_ref[...]
    if relu:
        y = jnp.maximum(y, 0.0)
    o_ref[...] = y.astype(o_ref.dtype)


def bn_act_2d(x2d, scale, shift, relu, out_dtype=jnp.float32):
    M, C = x2d.shape
    Cp = _round_up(C, 128)
    tm = min(1024, _round_up(M, 8))
    Mp = _round_up(M, tm)
    x_p = jnp.pad(x2d.astype(jnp.float32), ((0, Mp - M), (0, Cp - C)))
    s_p = jnp.pad(scale.astype(jnp.float32).reshape(1, C), ((0, 0), (0, Cp - C)))
    t_p = jnp.pad(shift.astype(jnp.float32).reshape(1, C), ((0, 0), (0, Cp - C)))
    out = pl.pallas_call(
        functools.partial(_bn_act_kernel, relu=relu),
        grid=(Mp // tm,),
        in_specs=[pl.BlockSpec((tm, Cp), lambda i: (i, 0)),
                  pl.BlockSpec((1, Cp), lambda i: (0, 0)),
                  pl.BlockSpec((1, Cp), lambda i: (0, 0))],
        out_specs=pl.BlockSpec((tm, Cp), lambda i: (i, 0)),
        out_shape=jax.ShapeDtypeStruct((Mp, Cp), out_dtype),
        compiler_params=_cparams(("parallel",)),
    )(x_p, s_p, t_p)
    return out[:M, :C]


# ------------------------------ pooling kernels ------------------------------

def _maxpool_kernel(x_ref, o_ref, *, oh, ow, k):
    # x_ref: (1, 2, 2, Hh, Wh, C) phase planes of one padded image (stride 2).
    acc = None
    for i in range(k):
        for j in range(k):
            v = x_ref[0, i % 2, j % 2,
                      i // 2:i // 2 + oh,
                      j // 2:j // 2 + ow, :]
            acc = v if acc is None else jnp.maximum(acc, v)
    o_ref[0] = acc


def maxpool_3x3_s2_p1(x):
    B, H, W, C = x.shape
    k, s, p = 3, 2, 1
    OH = (H + 2 * p - k) // s + 1
    OW = (W + 2 * p - k) // s + 1
    Hp, Wp = H + 2 * p, W + 2 * p
    Hh, Wh = (Hp + 1) // 2, (Wp + 1) // 2
    neg = float(jnp.finfo(jnp.float32).min)
    # Pad and de-interleave into (row-parity, col-parity) phase planes so that
    # every stride-2 window read inside the kernel is a contiguous slice.
    xp = jnp.pad(x.astype(jnp.float32),
                 ((0, 0), (p, 2 * Hh - Hp + p), (p, 2 * Wh - Wp + p), (0, 0)),
                 constant_values=neg)
    xq = xp.reshape(B, Hh, 2, Wh, 2, C).transpose(0, 2, 4, 1, 3, 5)
    return pl.pallas_call(
        functools.partial(_maxpool_kernel, oh=OH, ow=OW, k=k),
        grid=(B,),
        in_specs=[pl.BlockSpec((1, 2, 2, Hh, Wh, C),
                               lambda b: (b, 0, 0, 0, 0, 0))],
        out_specs=pl.BlockSpec((1, OH, OW, C), lambda b: (b, 0, 0, 0)),
        out_shape=jax.ShapeDtypeStruct((B, OH, OW, C), jnp.float32),
        compiler_params=_cparams(("parallel",)),
    )(xq)


def _avgpool_kernel(x_ref, o_ref, *, oh, ow, k):
    c = x_ref.shape[-1]
    acc = jnp.zeros((oh, ow, c), jnp.float32)
    for i in range(k):
        for j in range(k):
            acc = acc + x_ref[0, i:i + oh, j:j + ow, :]
    o_ref[0] = acc * (1.0 / (k * k))   # count_include_pad=True semantics


def avgpool_s1(x, k, pad):
    B, H, W, C = x.shape
    OH = H + 2 * pad - k + 1
    OW = W + 2 * pad - k + 1
    Hp, Wp = H + 2 * pad, W + 2 * pad
    xp = jnp.pad(x.astype(jnp.float32), ((0, 0), (pad, pad), (pad, pad), (0, 0)))
    return pl.pallas_call(
        functools.partial(_avgpool_kernel, oh=OH, ow=OW, k=k),
        grid=(B,),
        in_specs=[pl.BlockSpec((1, Hp, Wp, C), lambda b: (b, 0, 0, 0))],
        out_specs=pl.BlockSpec((1, OH, OW, C), lambda b: (b, 0, 0, 0)),
        out_shape=jax.ShapeDtypeStruct((B, OH, OW, C), jnp.float32),
        compiler_params=_cparams(("parallel",)),
    )(xp)


# ------------------------------ JAX glue ops ---------------------------------

def _out_size(h, k, s, p):
    return (h + 2 * p - k) // s + 1


def _extract_patches(x, kh, kw, stride, pad):
    # x: NHWC (bf16) -> (B*OH*OW, KH*KW*C) in (kh, kw, c) order (matches torch).
    B, H, W, C = x.shape
    OH = _out_size(H, kh, stride, pad)
    OW = _out_size(W, kw, stride, pad)
    xp = jnp.pad(x, ((0, 0), (pad, pad), (pad, pad), (0, 0)))
    slabs = []
    for i in range(kh):
        for j in range(kw):
            sl = xp[:, i:i + (OH - 1) * stride + 1:stride,
                    j:j + (OW - 1) * stride + 1:stride, :]
            slabs.append(sl)
    patches = jnp.stack(slabs, axis=3)            # (B, OH, OW, KH*KW, C)
    return patches.reshape(B * OH * OW, kh * kw * C), OH, OW


def conv2d_fused(x, w, stride, pad, scale=None, shift=None,
                 residual=None, relu=False, out_dtype=jnp.float32):
    # x: NHWC; w: torch layout (Cout, Cin, KH, KW).
    Cout, Cin, KH, KW = w.shape
    B = x.shape[0]
    cols, OH, OW = _extract_patches(x.astype(jnp.bfloat16), KH, KW, stride, pad)
    w2 = jnp.transpose(w, (2, 3, 1, 0)).reshape(KH * KW * Cin, Cout)
    if scale is None:
        scale = jnp.ones((Cout,), jnp.float32)
    if shift is None:
        shift = jnp.zeros((Cout,), jnp.float32)
    res2d = None
    if residual is not None:
        res2d = residual.reshape(B * OH * OW, Cout)
    out = matmul_fused(cols, w2, scale, shift, residual=res2d,
                       relu=relu, out_dtype=out_dtype)
    return out.reshape(B, OH, OW, Cout)


def _bn_scale_shift(p, eps=1e-5):
    scale = p["gamma"] / jnp.sqrt(p["var"] + eps)
    shift = p["beta"] - p["mean"] * scale
    return scale, shift


# ------------------------------ model forward --------------------------------

def basic_block(x, p):
    stride = p["stride"]
    s1, t1 = _bn_scale_shift(p["bn1"])
    s2, t2 = _bn_scale_shift(p["bn2"])
    B, H, W, C = x.shape
    # BN1 + ReLU (feeds only conv1 -> emit bf16 directly)
    r = bn_act_2d(x.reshape(B * H * W, C), s1, t1, relu=True,
                  out_dtype=jnp.bfloat16).reshape(B, H, W, C)
    # conv1 with BN2+ReLU fused into the matmul epilogue
    r = conv2d_fused(r, p["conv1_w"], stride, 1, scale=s2, shift=t2,
                     relu=True, out_dtype=jnp.bfloat16)
    # shortcut: 1x1 conv with its BN folded into the matmul epilogue
    if "sc_w" in p:
        ss, st = _bn_scale_shift(p["sc_bn"])
        sc = conv2d_fused(x, p["sc_w"], stride, 0, scale=ss, shift=st,
                          relu=False)
    else:
        sc = x
    # conv2 with bias + residual-add + ReLU fused into the matmul epilogue
    return conv2d_fused(r, p["conv2_w"], 1, 1, shift=p["conv2_b"],
                        residual=sc, relu=True)


def incresnet_forward(params, x_nchw):
    x = jnp.transpose(x_nchw, (0, 2, 3, 1)).astype(jnp.float32)  # NCHW -> NHWC
    # conv_input: 7x7 s2 conv with BN+ReLU fused, then 3x3 s2 maxpool
    s0, t0 = _bn_scale_shift(params["stem_bn"])
    x = conv2d_fused(x, params["stem_conv_w"], 2, 3, scale=s0, shift=t0,
                     relu=True)
    x = maxpool_3x3_s2_p1(x)
    # conv_block1..6
    for blk in params["blocks"]:
        x = basic_block(x, blk)
    # avg_pool (kernel 7, stride 1, padding 3, count_include_pad=True)
    x = avgpool_s1(x, 7, 3)
    # flatten exactly like PyTorch (NCHW ordering), then fc
    B = x.shape[0]
    flat = jnp.transpose(x, (0, 3, 1, 2)).reshape(B, -1)
    n_cls = params["fc_b"].shape[0]
    return matmul_fused(flat, params["fc_w_t"],
                        jnp.ones((n_cls,), jnp.float32), params["fc_b"],
                        relu=False)


# ------------------------------ parameter init -------------------------------

def _kaiming(key, shape):
    cout, _, kh, kw = shape
    fan_out = cout * kh * kw
    return jax.random.normal(key, shape, jnp.float32) * jnp.sqrt(2.0 / fan_out)


def _bn_params(key, c):
    k1, k2, k3, k4 = jax.random.split(key, 4)
    return {
        "gamma": 1.0 + 0.1 * jax.random.normal(k1, (c,), jnp.float32),
        "beta": 0.05 * jax.random.normal(k2, (c,), jnp.float32),
        "mean": 0.05 * jax.random.normal(k3, (c,), jnp.float32),
        "var": 1.0 + 0.1 * jax.random.uniform(k4, (c,), jnp.float32),
    }


def init_params(key, num_block, num_classes):
    keys = iter(jax.random.split(key, 512))
    params = {
        "stem_conv_w": _kaiming(next(keys), (64, 3, 7, 7)),
        "stem_bn": _bn_params(next(keys), 64),
    }
    blocks = []
    in_c = 64
    plan = [(64, num_block[0], 2), (128, num_block[1], 2), (256, num_block[2], 2),
            (512, num_block[3], 2), (512, num_block[4], 2), (512, num_block[5], 2)]
    for out_c, n, first_stride in plan:
        for s in [first_stride] + [1] * (n - 1):
            blk = {
                "stride": s,
                "bn1": _bn_params(next(keys), in_c),
                "conv1_w": _kaiming(next(keys), (out_c, in_c, 3, 3)),
                "bn2": _bn_params(next(keys), out_c),
                "conv2_w": _kaiming(next(keys), (out_c, out_c, 3, 3)),
                "conv2_b": 0.01 * jax.random.normal(next(keys), (out_c,), jnp.float32),
            }
            if s != 1 or in_c != out_c:
                blk["sc_w"] = _kaiming(next(keys), (out_c, in_c, 1, 1))
                blk["sc_bn"] = _bn_params(next(keys), out_c)
            blocks.append(blk)
            in_c = out_c
    params["blocks"] = blocks
    bound = 1.0 / jnp.sqrt(512.0)
    params["fc_w_t"] = jax.random.uniform(next(keys), (512, num_classes),
                                          jnp.float32, -bound, bound)
    params["fc_b"] = jax.random.uniform(next(keys), (num_classes,),
                                        jnp.float32, -bound, bound)
    return params


# ---------------------------------- main --------------------------------------

if __name__ == "__main__":
    key = jax.random.PRNGKey(0)
    kp, kx = jax.random.split(key)

    num_block = [1, 1, 1, 1, 1, 1]   # one BasicBlock per stage (small config)
    num_classes = 10

    params = init_params(kp, num_block, num_classes)
    # PyTorch-style NCHW input; 16x16 spatial shrinks to 1x1 before the fc,
    # exactly matching the `view(B, -1)` -> Linear(512, n_cls) contract.
    x = jax.random.normal(kx, (2, 3, 16, 16), jnp.float32)

    out = incresnet_forward(params, x)
    out = jax.block_until_ready(out)
    assert out.shape == (2, num_classes)
    assert bool(jnp.all(jnp.isfinite(out)))
    print("KERNEL_OK")
</pallas_src>

<mosaic_0001>
module attributes {stable_mosaic.version = 11 : i64} {
  func.func @_mm_kernel(%arg0: i32, %arg1: i32, %arg2: i32, %arg3: memref<128x256xbf16, #tpu.memory_space<vmem>>, %arg4: memref<256x128xbf16, #tpu.memory_space<vmem>>, %arg5: memref<1x128xf32, #tpu.memory_space<vmem>>, %arg6: memref<1x128xf32, #tpu.memory_space<vmem>>, %arg7: memref<128x128xf32, #tpu.memory_space<vmem>>, %arg8: memref<128x128xf32, #tpu.memory_space<vmem>>) attributes {dimension_semantics = [#tpu.dimension_semantics<parallel>, #tpu.dimension_semantics<parallel>, #tpu.dimension_semantics<arbitrary>], iteration_bounds = array<i64: 1, 1, 1>, scalar_prefetch = 0 : i64, scratch_operands = 1 : i64, tpu.core_type = #tpu.core_type<tc>, window_params = [{transform_indices = @transform_0, window_bounds = array<i64: 128, 256>}, {transform_indices = @transform_1, window_bounds = array<i64: 256, 128>}, {transform_indices = @transform_2, window_bounds = array<i64: 1, 128>}, {transform_indices = @transform_3, window_bounds = array<i64: 1, 128>}, {transform_indices = @transform_4, window_bounds = array<i64: 128, 128>}]} {
    %c0_i32 = arith.constant 0 : i32
    %0 = arith.cmpi eq, %arg2, %c0_i32 : i32
    %1 = arith.extui %0 : i1 to i32
    %c0_i32_0 = arith.constant 0 : i32
    %2 = arith.cmpi ne, %1, %c0_i32_0 : i32
    scf.if %2 {
      %cst_10 = arith.constant 0.000000e+00 : f32
      %12 = vector.broadcast %cst_10 : f32 to vector<128x128xf32>
      %c0_11 = arith.constant 0 : index
      %c0_12 = arith.constant 0 : index
      %13 = vector.load %arg8[%c0_11, %c0_12] : memref<128x128xf32, #tpu.memory_space<vmem>>, vector<128x128xf32>
      tpu.vector_store %arg8[%c0_11, %c0_12], %12 {strides = array<i32>} : memref<128x128xf32, #tpu.memory_space<vmem>>, vector<128x128xf32>,
    } else {
    }
    %c0 = arith.constant 0 : index
    %c0_1 = arith.constant 0 : index
    %3 = vector.load %arg8[%c0, %c0_1] : memref<128x128xf32, #tpu.memory_space<vmem>>, vector<128x128xf32>
    %c0_2 = arith.constant 0 : index
    %c0_3 = arith.constant 0 : index
    %4 = vector.load %arg3[%c0_2, %c0_3] : memref<128x256xbf16, #tpu.memory_space<vmem>>, vector<128x256xbf16>
    %c0_4 = arith.constant 0 : index
    %c0_5 = arith.constant 0 : index
    %5 = vector.load %arg4[%c0_4, %c0_5] : memref<256x128xbf16, #tpu.memory_space<vmem>>, vector<256x128xbf16>
    %cst = arith.constant dense<0.000000e+00> : vector<128x128xf32>
    %6 = tpu.matmul %4, %5, %cst {dimension_numbers = #tpu.dot_dimension_numbers<[1], [0], [0], [1], [0, 0, 1, 1], [], []>} : vector<128x256xbf16>, vector<256x128xbf16>, vector<128x128xf32> -> vector<128x128xf32>
    %7 = arith.addf %3, %6 : vector<128x128xf32>
    %c0_6 = arith.constant 0 : index
    %c0_7 = arith.constant 0 : index
    %8 = vector.load %arg8[%c0_6, %c0_7] : memref<128x128xf32, #tpu.memory_space<vmem>>, vector<128x128xf32>
    tpu.vector_store %arg8[%c0_6, %c0_7], %7 {strides = array<i32>} : memref<128x128xf32, #tpu.memory_space<vmem>>, vector<128x128xf32>,
    %c0_i32_8 = arith.constant 0 : i32
    %9 = arith.cmpi eq, %arg2, %c0_i32_8 : i32
    %10 = arith.extui %9 : i1 to i32
    %c0_i32_9 = arith.constant 0 : i32
    %11 = arith.cmpi ne, %10, %c0_i32_9 : i32
    scf.if %11 {
      %c0_10 = arith.constant 0 : index
      %c0_11 = arith.constant 0 : index
      %12 = vector.load %arg8[%c0_10, %c0_11] : memref<128x128xf32, #tpu.memory_space<vmem>>, vector<128x128xf32>
      %c0_12 = arith.constant 0 : index
      %c0_13 = arith.constant 0 : index
      %13 = vector.load %arg5[%c0_12, %c0_13] : memref<1x128xf32, #tpu.memory_space<vmem>>, vector<1x128xf32>
      %14 = vector.broadcast %13 : vector<1x128xf32> to vector<128x128xf32>
      %15 = arith.mulf %12, %14 : vector<128x128xf32>
      %c0_14 = arith.constant 0 : index
      %c0_15 = arith.constant 0 : index
      %16 = vector.load %arg6[%c0_14, %c0_15] : memref<1x128xf32, #tpu.memory_space<vmem>>, vector<1x128xf32>
      %17 = vector.broadcast %16 : vector<1x128xf32> to vector<128x128xf32>
      %18 = arith.addf %15, %17 : vector<128x128xf32>
      %cst_16 = arith.constant 0.000000e+00 : f32
      %19 = vector.broadcast %cst_16 : f32 to vector<128x128xf32>
      %20 = arith.maximumf %18, %19 : vector<128x128xf32>
      %c0_17 = arith.constant 0 : index
      %c0_18 = arith.constant 0 : index
      %21 = vector.load %arg7[%c0_17, %c0_18] : memref<128x128xf32, #tpu.memory_space<vmem>>, vector<128x128xf32>
      tpu.vector_store %arg7[%c0_17, %c0_18], %20 {strides = array<i32>} : memref<128x128xf32, #tpu.memory_space<vmem>>, vector<128x128xf32>,
    } else {
    }
    return
  }
  func.func @transform_0(%arg0: i32, %arg1: i32, %arg2: i32) -> (i32, i32) {
    %c0_i32 = arith.constant 0 : i32
    return %arg0, %arg2 : i32, i32
  }
  func.func @transform_1(%arg0: i32, %arg1: i32, %arg2: i32) -> (i32, i32) {
    %c0_i32 = arith.constant 0 : i32
    return %arg2, %arg1 : i32, i32
  }
  func.func @transform_2(%arg0: i32, %arg1: i32, %arg2: i32) -> (i32, i32) {
    %c0_i32 = arith.constant 0 : i32
    %c0_i32_0 = arith.constant 0 : i32
    return %c0_i32, %arg1 : i32, i32
  }
  func.func @transform_3(%arg0: i32, %arg1: i32, %arg2: i32) -> (i32, i32) {
    %c0_i32 = arith.constant 0 : i32
    %c0_i32_0 = arith.constant 0 : i32
    return %c0_i32, %arg1 : i32, i32
  }
  func.func @transform_4(%arg0: i32, %arg1: i32, %arg2: i32) -> (i32, i32) {
    %c0_i32 = arith.constant 0 : i32
    return %arg0, %arg1 : i32, i32
  }
}

</mosaic_0001>

<bundles_post_ra>
// kernel: tpu_custom_call.1
= control target key start
LH: loop header
LB: loop body
LE: loop exit
PB: predicated region body
PF: predicated region fallthrough
CT: control target
= control target key end

     0   :  { %9 = vsyncpa [#allocation4], 0  ;;  %s900_s0 = inlined_call_operand.hbm [shape: bf16[128,256], index: 0, kind: input, shape index: {}]   ;;  %s901_s1 = inlined_call_operand.hbm [shape: bf16[256,128], index: 1, kind: input, shape index: {}]   ;;  %s902_s2 = inlined_call_operand.vmem [shape: f32[1,128], index: 2, kind: input, shape index: {}]   ;;  %s903_s3 = inlined_call_operand.vmem [shape: f32[1,128], index: 3, kind: input, shape index: {}]   ;;  %s904_s4 = inlined_call_operand.hbm [shape: f32[128,128], index: 4, kind: output, shape index: {}]  }
   0x1   :  { %10 = vsyncpa [#allocation7], 0 }
   0x2   :  { %11 = vsyncpa [#allocation5], 0  ;;  %s784_s15 = smov [#allocation3]   ;;  %s712_s19 = scalar_lea.hbm %s900_s0, 2048 }
   0x3   :  { %s17_s16 = sshll.u32 %s784_s15, 4  ;;  %p713_p0 = scmp.ne.s32.totalorder %s900_s0, %s712_s19  ;;  %s18_s16 = int_to_ptr.vmem [resolvable:$true] %s17_s16 }
   0x4   :  { %p716_p1 = scmp.lt.u32.totalorder %s712_s19, %s900_s0 }
   0x6   :  { %p718_p2 = pnand %p716_p1, %p713_p0 }
   0x8   :  { %721 = shalt.err (!%p718_p2)
}
   0x9   :  { %s722_s24 = scalar_lea.vmem %s18_s16, 2048  ;;  %p727_p4 = scmp.lt.s32.totalorder %s18_s16, %s18_s16 }
   0xa   :  { %p723_p3 = scmp.ne.s32.totalorder %s18_s16, %s722_s24  ;;  %p728_p5 = scmp.lt.s32.totalorder %s722_s24, %s722_s24 }
   0xc   :  { %p729_p6 = por %p728_p5, %p727_p4 }
   0xe   :  { %p730_p7 = pnand %p729_p6, %p723_p3 }
  0x10   :  { %733 = shalt.err (!%p730_p7)
}
  0x11   :  { %s785_s25 = smov 128   ;;  %s786_s26 = smov 8  }
  0x12   :  { %23 = dma.hbm_to_vmem [thread:$0]  %s900_s0, 2048, %s18_s16, [#allocation4], %s785_s25, %s785_s25, %s786_s26  }
  0x13   :  { %s787_s29 = smov [#allocation6]   ;;  %s734_s7 = scalar_lea.hbm %s901_s1, 2048 }
  0x14   :  { %s29_s30 = sshll.u32 %s787_s29, 4  ;;  %p735_p8 = scmp.ne.s32.totalorder %s901_s1, %s734_s7  ;;  %s30_s30 = int_to_ptr.vmem [resolvable:$true] %s29_s30 }
  0x15   :  { %p738_p9 = scmp.lt.u32.totalorder %s734_s7, %s901_s1 }
  0x17   :  { %p740_p10 = pnand %p738_p9, %p735_p8 }
  0x19   :  { %743 = shalt.err (!%p740_p10)
}
  0x1a   :  { %s744_s12 = scalar_lea.vmem %s30_s30, 2048  ;;  %p749_p12 = scmp.lt.s32.totalorder %s30_s30, %s30_s30 }
  0x1b   :  { %p745_p11 = scmp.ne.s32.totalorder %s30_s30, %s744_s12  ;;  %p750_p13 = scmp.lt.s32.totalorder %s744_s12, %s744_s12 }
  0x1d   :  { %p751_p0 = por %p750_p13, %p749_p12 }
  0x1f   :  { %p752_p1 = pnand %p751_p0, %p745_p11 }
  0x21   :  { %755 = shalt.err (!%p752_p1)
}
  0x22   :  { %s788_s0 = smov 64   ;;  %s789_s13 = smov 4  }
  0x23   :  { %35 = dma.hbm_to_vmem [thread:$0]  %s901_s1, 2048, %s30_s30, [#allocation7], %s788_s0, %s788_s0, %s789_s13  }
  0x24   :  { %778 = dma.done.wait [#allocation4], 2048  }
  0x25   :  { %779 = vsyncadd [#allocation4], 4294965248 }
  0x26   :  { %780 = dma.done.wait [#allocation7], 2048  }
  0x27   :  { %781 = vsyncadd [#allocation7], 4294965248  ;;  %v672_v0 = vld [vmem:[#allocation6 + $0x40] sm:$0xff]   ;;  %v674_v2 = vld [vmem:[#allocation6 + $0x48] sm:$0xff]  }
  0x28   :  { %v673_v1 = vld [vmem:[#allocation6] sm:$0xff]   ;;  %585 = vmatprep.subr.bf16.mxu0 %v672_v0  ;;  %649 = vmatprep.subr.bf16.mxu1 %v672_v0  ;;  %v675_v3 = vld [vmem:[#allocation6 + $0x8] sm:$0xff]   ;;  %v676_v4 = vld [vmem:[#allocation6 + $0x50] sm:$0xff]  }
  0x29   :  { %586 = vmatpush3.bf16.msra.mxu0 %v673_v1  ;;  %657 = vmatpush3.bf16.msra.mxu1 %v673_v1  ;;  %v677_v5 = vld [vmem:[#allocation6 + $0x10] sm:$0xff]   ;;  %v678_v6 = vld [vmem:[#allocation6 + $0x58] sm:$0xff]   ;;  %v680_v8 = vld [vmem:[#allocation6 + $0x60] sm:$0xff]  }
  0x2a   :  { %587 = vmatprep.subr.bf16.mxu0 %v674_v2  ;;  %650 = vmatprep.subr.bf16.mxu1 %v674_v2  ;;  %v679_v7 = vld [vmem:[#allocation6 + $0x18] sm:$0xff]   ;;  %v681_v9 = vld [vmem:[#allocation6 + $0x20] sm:$0xff]   ;;  %v682_v10 = vld [vmem:[#allocation6 + $0x68] sm:$0xff]  }
  0x2b   :  { %v690_v11 = vld [vmem:[#allocation3 + $0x4] ss:$8 sps:$4 sm:$0xff]   ;;  %v684_v14 = vld [vmem:[#allocation6 + $0x70] sm:$0xff]   ;;  %v686_v16 = vld [vmem:[#allocation6 + $0x78] sm:$0xff]  }
  0x2c   :  { %v693_v12 = vld [vmem:[#allocation3 + $0x44] ss:$8 sps:$4 sm:$0xff]   ;;  %339 = vmatprep.mubr.bf16.mxu0 %v690_v11  ;;  %v685_v15 = vld [vmem:[#allocation6 + $0x30] sm:$0xff]   ;;  %v687_v17 = vld [vmem:[#allocation6 + $0x38] sm:$0xff]  }
  0x2d   :  { %588 = vmatpush3.bf16.msra.mxu0 %v675_v3  ;;  %658 = vmatpush3.bf16.msra.mxu1 %v675_v3  ;;  %v683_v13 = vld [vmem:[#allocation6 + $0x28] sm:$0xff]   ;;  %v694_v20 = vld [vmem:[#allocation3 + $0x14] ss:$8 sps:$4 sm:$0xff]   ;;  %v698_v22 = vld [vmem:[#allocation3 + $0x10] ss:$8 sps:$4 sm:$0xff]  }
  0x2e   :  { %589 = vmatprep.subr.bf16.mxu0 %v676_v4  ;;  %651 = vmatprep.subr.bf16.mxu1 %v676_v4  ;;  %v688_v18 = vld [vmem:[#allocation3] ss:$8 sps:$4 sm:$0xff]   ;;  %v696_v21 = vld [vmem:[#allocation3 + $0x54] ss:$8 sps:$4 sm:$0xff]   ;;  %v699_v23 = vld [vmem:[#allocation3 + $0x50] ss:$8 sps:$4 sm:$0xff]  }
  0x2f   :  { %371 = vmatprep.mubr.bf16.mxu1 %v693_v12  ;;  %v691_v19 = vld [vmem:[#allocation3 + $0x40] ss:$8 sps:$4 sm:$0xff]   ;;  %v700_v24 = vld [vmem:[#allocation3 + $0x24] ss:$8 sps:$4 sm:$0xff]   ;;  %v706_v28 = vld [vmem:[#allocation3 + $0x34] ss:$8 sps:$4 sm:$0xff]  }
  0x30   :  { %v702_v25 = vld [vmem:[#allocation3 + $0x64] ss:$8 sps:$4 sm:$0xff]   ;;  %v704_v26 = vld [vmem:[#allocation3 + $0x20] ss:$8 sps:$4 sm:$0xff]   ;;  %v708_v29 = vld [vmem:[#allocation3 + $0x74] ss:$8 sps:$4 sm:$0xff]  }
  0x31   :  { %590 = vmatpush3.bf16.msra.mxu0 %v677_v5  ;;  %659 = vmatpush3.bf16.msra.mxu1 %v677_v5  ;;  %v705_v27 = vld [vmem:[#allocation3 + $0x60] ss:$8 sps:$4 sm:$0xff]   ;;  %v710_v30 = vld [vmem:[#allocation3 + $0x30] ss:$8 sps:$4 sm:$0xff]  }
  0x32   :  { %591 = vmatprep.subr.bf16.mxu0 %v678_v6  ;;  %652 = vmatprep.subr.bf16.mxu1 %v678_v6  ;;  %v711_v31 = vld [vmem:[#allocation3 + $0x70] ss:$8 sps:$4 sm:$0xff]   ;;  %v846_v35 = vld [vmem:[%s902_s2] ss:$0 sm:$0xff]  ;;  %s790_s2 = smov [#allocation8]  }
  0x33   :  { %v851_v41 = vld [vmem:[%s903_s3] ss:$0 sm:$0xff]  ;;  %s538_s3 = sshll.u32 %s790_s2, 4  ;;  %s539_s3 = int_to_ptr.vmem [resolvable:$true] %s538_s3 }
  0x34   :  { %s756_s19 = scalar_lea.vmem %s539_s3, 2048  ;;  %p761_p3 = scmp.lt.s32.totalorder %s539_s3, %s539_s3 }
  0x35   :  { %592 = vmatpush3.bf16.msra.mxu0 %v679_v7  ;;  %660 = vmatpush3.bf16.msra.mxu1 %v679_v7  ;;  %p757_p2 = scmp.ne.s32.totalorder %s539_s3, %s756_s19  ;;  %p762_p4 = scmp.lt.s32.totalorder %s756_s19, %s756_s19 }
  0x36   :  { %593 = vmatprep.subr.bf16.mxu0 %v680_v8  ;;  %653 = vmatprep.subr.bf16.mxu1 %v680_v8 }
  0x37   :  { %p763_p5 = por %p762_p4, %p761_p3 }
  0x39   :  { %594 = vmatpush3.bf16.msra.mxu0 %v681_v9  ;;  %661 = vmatpush3.bf16.msra.mxu1 %v681_v9  ;;  %p764_p6 = pnand %p763_p5, %p757_p2 }
  0x3a   :  { %595 = vmatprep.subr.bf16.mxu0 %v682_v10  ;;  %654 = vmatprep.subr.bf16.mxu1 %v682_v10 }
  0x3d   :  { %596 = vmatpush3.bf16.msra.mxu0 %v683_v13  ;;  %662 = vmatpush3.bf16.msra.mxu1 %v683_v13 }
  0x3e   :  { %597 = vmatprep.subr.bf16.mxu0 %v684_v14  ;;  %655 = vmatprep.subr.bf16.mxu1 %v684_v14 }
  0x41   :  { %598 = vmatpush3.bf16.msra.mxu0 %v685_v15  ;;  %663 = vmatpush3.bf16.msra.mxu1 %v685_v15 }
  0x42   :  { %599 = vmatprep.subr.bf16.mxu0 %v686_v16  ;;  %656 = vmatprep.subr.bf16.mxu1 %v686_v16 }
  0x45   :  { %600 = vmatpush3.bf16.msra.mxu0 %v687_v17  ;;  %664 = vmatpush3.bf16.msra.mxu1 %v687_v17 }
  0x48   :  { %340 = vmatmul.mubr.bf16.vlgmr.msra.gmra.mrb[0].mxu0 %v688_v18  ;;  %372 = vmatmul.mubr.bf16.vlgmr.msra.gmra.mrb[0].mxu1 %v691_v19 }
  0x49   :  { %347 = vmatprep.mubr.bf16.mxu0 %v694_v20  ;;  %379 = vmatprep.mubr.bf16.mxu1 %v696_v21 }
  0x50   :  { %348 = vmatmul.mubr.bf16.gmra.mrb[4].mxu0 %v698_v22  ;;  %380 = vmatmul.mubr.bf16.gmra.mrb[4].mxu1 %v699_v23 }
  0x51   :  { %355 = vmatprep.mubr.bf16.mxu0 %v700_v24  ;;  %387 = vmatprep.mubr.bf16.mxu1 %v702_v25 }
  0x58   :  { %356 = vmatmul.mubr.bf16.gmra.mrb[8].mxu0 %v704_v26  ;;  %388 = vmatmul.mubr.bf16.gmra.mrb[8].mxu1 %v705_v27 }
  0x59   :  { %363 = vmatprep.mubr.bf16.mxu0 %v706_v28  ;;  %395 = vmatprep.mubr.bf16.mxu1 %v708_v29 }
  0x60   :  { %364 = vmatmul.mubr.bf16.gmra.mrb[12].mxu0 %v710_v30  ;;  %396 = vmatmul.mubr.bf16.gmra.mrb[12].mxu1 %v711_v31 }
 0x11b   :  { %v601_v32 = vpop.f32.mrb[0].mxu0  ;;  %v625_v33 = vpop.f32.mrb[0].mxu1 }
 0x11c   :  { %v602_v34 = vpop.f32.mrb[1].mxu0  ;;  %v626_v36 = vpop.f32.mrb[1].mxu1 }
 0x11d   :  { %v603_v37 = vadd.f32 %v602_v34, %v601_v32  ;;  %v627_v38 = vadd.f32 %v626_v36, %v625_v33  ;;  %v604_v39 = vpop.f32.mrb[2].mxu0  ;;  %v628_v40 = vpop.f32.mrb[2].mxu1 }
 0x11e   :  { %v605_v42 = vpop.f32.mrb[3].mxu0  ;;  %v629_v43 = vpop.f32.mrb[3].mxu1 }
 0x11f   :  { %v462_v44 = vmul.f32 %v603_v37, %v846_v35  ;;  %v470_v45 = vmul.f32 %v627_v38, %v846_v35  ;;  %v606_v46 = vadd.f32 %v605_v42, %v604_v39  ;;  %v630_v47 = vadd.f32 %v629_v43, %v628_v40 }
 0x121   :  { %v485_v48 = vadd.f32 %v851_v41, %v462_v44  ;;  %v493_v49 = vadd.f32 %v851_v41, %v470_v45  ;;  %v463_v50 = vmul.f32 %v606_v46, %v846_v35  ;;  %v471_v51 = vmul.f32 %v630_v47, %v846_v35 }
 0x123   :  { %v501_v52 = vmax.f32 %v485_v48, 0.0  ;;  %v509_v53 = vmax.f32 %v493_v49, 0.0  ;;  %v486_v54 = vadd.f32 %v851_v41, %v463_v50  ;;  %v494_v55 = vadd.f32 %v851_v41, %v471_v51  ;;  %v607_v56 = vpop.f32.mrb[4].mxu0  ;;  %v631_v57 = vpop.f32.mrb[4].mxu1 }
 0x124   :  { %v608_v58 = vpop.f32.mrb[5].mxu0  ;;  %v632_v59 = vpop.f32.mrb[5].mxu1 }
 0x125   :  { %517 = vst [vmem:[#allocation8] sm:$0xff] %v501_v52  ;;  %525 = vst [vmem:[#allocation8 + $0x40] sm:$0xff] %v509_v53  ;;  %v502_v60 = vmax.f32 %v486_v54, 0.0  ;;  %v510_v61 = vmax.f32 %v494_v55, 0.0  ;;  %v609_v62 = vadd.f32 %v608_v58, %v607_v56  ;;  %v633_v63 = vadd.f32 %v632_v59, %v631_v57  ;;  %v610_v0 = vpop.f32.mrb[6].mxu0  ;;  %v634_v1 = vpop.f32.mrb[6].mxu1 }
 0x126   :  { %v611_v2 = vpop.f32.mrb[7].mxu0  ;;  %v635_v3 = vpop.f32.mrb[7].mxu1 }
 0x127   :  { %518 = vst [vmem:[#allocation8 + $0x8] sm:$0xff] %v502_v60  ;;  %526 = vst [vmem:[#allocation8 + $0x48] sm:$0xff] %v510_v61  ;;  %v464_v4 = vmul.f32 %v609_v62, %v846_v35  ;;  %v472_v5 = vmul.f32 %v633_v63, %v846_v35  ;;  %v612_v6 = vadd.f32 %v611_v2, %v610_v0 }
 0x128   :  { %v636_v7 = vadd.f32 %v635_v3, %v634_v1 }
 0x129   :  { %v487_v8 = vadd.f32 %v851_v41, %v464_v4  ;;  %v495_v9 = vadd.f32 %v851_v41, %v472_v5  ;;  %v465_v10 = vmul.f32 %v612_v6, %v846_v35 }
 0x12a   :  { %v473_v11 = vmul.f32 %v636_v7, %v846_v35 }
 0x12b   :  { %v503_v12 = vmax.f32 %v487_v8, 0.0  ;;  %v511_v13 = vmax.f32 %v495_v9, 0.0  ;;  %v488_v14 = vadd.f32 %v851_v41, %v465_v10  ;;  %v613_v16 = vpop.f32.mrb[8].mxu0  ;;  %v637_v17 = vpop.f32.mrb[8].mxu1 }
 0x12c   :  { %v496_v15 = vadd.f32 %v851_v41, %v473_v11  ;;  %v614_v18 = vpop.f32.mrb[9].mxu0  ;;  %v638_v19 = vpop.f32.mrb[9].mxu1 }
 0x12d   :  { %519 = vst [vmem:[#allocation8 + $0x10] sm:$0xff] %v503_v12  ;;  %527 = vst [vmem:[#allocation8 + $0x50] sm:$0xff] %v511_v13  ;;  %v504_v20 = vmax.f32 %v488_v14, 0.0  ;;  %v615_v22 = vadd.f32 %v614_v18, %v613_v16  ;;  %v639_v23 = vadd.f32 %v638_v19, %v637_v17  ;;  %v616_v24 = vpop.f32.mrb[10].mxu0  ;;  %v640_v25 = vpop.f32.mrb[10].mxu1 }
 0x12e   :  { %v512_v21 = vmax.f32 %v496_v15, 0.0  ;;  %v617_v26 = vpop.f32.mrb[11].mxu0  ;;  %v641_v27 = vpop.f32.mrb[11].mxu1 }
 0x12f   :  { %520 = vst [vmem:[#allocation8 + $0x18] sm:$0xff] %v504_v20  ;;  %v466_v28 = vmul.f32 %v615_v22, %v846_v35  ;;  %v474_v29 = vmul.f32 %v639_v23, %v846_v35  ;;  %v618_v30 = vadd.f32 %v617_v26, %v616_v24  ;;  %v642_v31 = vadd.f32 %v641_v27, %v640_v25 }
 0x130   :  { %528 = vst [vmem:[#allocation8 + $0x58] sm:$0xff] %v512_v21 }
 0x131   :  { %v489_v32 = vadd.f32 %v851_v41, %v466_v28  ;;  %v497_v33 = vadd.f32 %v851_v41, %v474_v29  ;;  %v467_v34 = vmul.f32 %v618_v30, %v846_v35  ;;  %v475_v36 = vmul.f32 %v642_v31, %v846_v35 }
 0x133   :  { %v505_v37 = vmax.f32 %v489_v32, 0.0  ;;  %v513_v38 = vmax.f32 %v497_v33, 0.0  ;;  %v490_v39 = vadd.f32 %v851_v41, %v467_v34  ;;  %v498_v40 = vadd.f32 %v851_v41, %v475_v36  ;;  %v619_v42 = vpop.f32.mrb[12].mxu0  ;;  %v643_v43 = vpop.f32.mrb[12].mxu1 }
 0x134   :  { %v620_v44 = vpop.f32.mrb[13].mxu0  ;;  %v644_v45 = vpop.f32.mrb[13].mxu1 }
 0x135   :  { %521 = vst [vmem:[#allocation8 + $0x20] sm:$0xff] %v505_v37  ;;  %529 = vst [vmem:[#allocation8 + $0x60] sm:$0xff] %v513_v38  ;;  %v506_v46 = vmax.f32 %v490_v39, 0.0  ;;  %v514_v47 = vmax.f32 %v498_v40, 0.0  ;;  %v621_v48 = vadd.f32 %v620_v44, %v619_v42  ;;  %v645_v49 = vadd.f32 %v644_v45, %v643_v43  ;;  %v622_v50 = vpop.f32.mrb[14].mxu0  ;;  %v646_v51 = vpop.f32.mrb[14].mxu1 }
 0x136   :  { %v623_v52 = vpop.f32.mrb[15].mxu0  ;;  %v647_v53 = vpop.f32.mrb[15].mxu1 }
 0x137   :  { %522 = vst [vmem:[#allocation8 + $0x28] sm:$0xff] %v506_v46  ;;  %530 = vst [vmem:[#allocation8 + $0x68] sm:$0xff] %v514_v47  ;;  %v468_v54 = vmul.f32 %v621_v48, %v846_v35  ;;  %v476_v55 = vmul.f32 %v645_v49, %v846_v35  ;;  %v624_v56 = vadd.f32 %v623_v52, %v622_v50 }
 0x138   :  { %v648_v57 = vadd.f32 %v647_v53, %v646_v51 }
 0x139   :  { %v491_v58 = vadd.f32 %v851_v41, %v468_v54  ;;  %v499_v59 = vadd.f32 %v851_v41, %v476_v55  ;;  %v469_v60 = vmul.f32 %v624_v56, %v846_v35 }
 0x13a   :  { %v477_v61 = vmul.f32 %v648_v57, %v846_v35 }
 0x13b   :  { %v507_v62 = vmax.f32 %v491_v58, 0.0  ;;  %v515_v63 = vmax.f32 %v499_v59, 0.0  ;;  %v492_v0 = vadd.f32 %v851_v41, %v469_v60 }
 0x13c   :  { %v500_v1 = vadd.f32 %v851_v41, %v477_v61 }
 0x13d   :  { %523 = vst [vmem:[#allocation8 + $0x30] sm:$0xff] %v507_v62  ;;  %531 = vst [vmem:[#allocation8 + $0x70] sm:$0xff] %v515_v63  ;;  %v508_v2 = vmax.f32 %v492_v0, 0.0 }
 0x13e   :  { %v516_v3 = vmax.f32 %v500_v1, 0.0 }
 0x13f   :  { %524 = vst [vmem:[#allocation8 + $0x38] sm:$0xff] %v508_v2 }
 0x140   :  { %532 = vst [vmem:[#allocation8 + $0x78] sm:$0xff] %v516_v3 }
 0x141   :  { %767 = shalt.err (!%p764_p6)
}
 0x142   :  { %s768_s22 = scalar_lea.hbm %s904_s4, 2048 }
 0x143   :  { %p769_p7 = scmp.ne.s32.totalorder %s904_s4, %s768_s22  ;;  %p772_p8 = scmp.lt.u32.totalorder %s768_s22, %s904_s4 }
 0x145   :  { %p774_p9 = pnand %p772_p8, %p769_p7 }
 0x147   :  { %777 = shalt.err (!%p774_p9)
}
 0x148   :  { %544 = dma.vmem_to_hbm [thread:$0]  %s539_s3, 2048, %s904_s4, [#allocation5], %s785_s25, %s785_s25, %s786_s26  }
 0x149   :  { %782 = dma.done.wait [#allocation5], 2048  }
 0x14a   :  { %783 = vsyncadd [#allocation5], 4294965248 }
 0x14b   :  { %548 = vsyncpa [#allocation4], 1 }
 0x14c   :  { %549 = vsyncpa [#allocation7], 1 }
 0x14d   :  { %550 = vsyncpa [#allocation5], 1 }

</bundles_post_ra>
